<compile_context>
chip_gen: v6e
topology: v6e:2x2x1
jax: 0.10.0
libtpu: 0.0.40
codegen_flags: <defaults>
</compile_context>

<pallas_src>
import jax
import jax.numpy as jnp
from jax.experimental import pallas as pl
from jax.experimental.pallas import tpu as pltpu

_LANE = 128                      # vreg lane width; last block dim on the aligned path
_TILE_BYTES_PER_PLANE = 1 << 20  # 1 MiB per channel plane per block (f32: 2048 rows)
_MIN_GRID_STEPS = 8              # pipeline overlap + v7x dual-TC sharding floor


def _rgb_to_yuv_kernel(x_ref, o_ref):
    # x_ref / o_ref: (1, 3, tile, lane) blocks in VMEM. Compute in f32 regardless
    # of I/O dtype; downcast only at the store.
    r = x_ref[0, 0, :, :].astype(jnp.float32)
    g = x_ref[0, 1, :, :].astype(jnp.float32)
    b = x_ref[0, 2, :, :].astype(jnp.float32)

    y = 0.299 * r + 0.587 * g + 0.114 * b
    u = -0.147 * r - 0.289 * g + 0.436 * b
    v = 0.615 * r - 0.515 * g - 0.1 * b

    o_ref[0, 0, :, :] = y.astype(o_ref.dtype)
    o_ref[0, 1, :, :] = u.astype(o_ref.dtype)
    o_ref[0, 2, :, :] = v.astype(o_ref.dtype)


def _pick_row_tile(rows: int, bytes_per_row: int, batch: int) -> int:
    """Sublane tile (multiple of 8, or == rows) bounded by a VMEM byte budget and
    floored so the grid has >= _MIN_GRID_STEPS total steps when possible."""
    if rows <= 8:
        return rows
    budget = max(8, (_TILE_BYTES_PER_PLANE // max(bytes_per_row, 1)) // 8 * 8)
    tiles_wanted = max(1, -(-_MIN_GRID_STEPS // batch))   # ceil(min_steps / batch)
    cap = -(-rows // tiles_wanted)                        # rows per tile for that many tiles
    cap = -(-cap // 8) * 8                                # round up to a multiple of 8
    tile = min(budget, cap)
    return rows if tile >= rows else tile


def _launch(x4: jax.Array, row_tile: int) -> jax.Array:
    """x4: (B, 3, rows, lane). lane is either 128 (aligned path) or the full W."""
    B, C, rows, lane = x4.shape
    grid = (B, pl.cdiv(rows, row_tile))
    block = (1, C, row_tile, lane)
    return pl.pallas_call(
        _rgb_to_yuv_kernel,
        out_shape=jax.ShapeDtypeStruct(x4.shape, x4.dtype),
        grid_spec=pltpu.PrefetchScalarGridSpec(
            num_scalar_prefetch=0,
            grid=grid,
            in_specs=[pl.BlockSpec(block, lambda b, t: (b, 0, t, 0))],
            out_specs=pl.BlockSpec(block, lambda b, t: (b, 0, t, 0)),
        ),
        compiler_params=pltpu.CompilerParams(
            dimension_semantics=("parallel", "parallel"),
        ),
    )(x4)


def rgb_to_yuv(x: jax.Array) -> jax.Array:
    """Convert RGB -> YUV. Accepts (3, H, W) or (B, 3, H, W), any float dtype."""
    squeeze_batch = False
    if x.ndim == 3:
        x = x[None]
        squeeze_batch = True
    if x.ndim != 4 or x.shape[1] != 3:
        raise ValueError(f"Expected (*, 3, H, W) with 3 channels, got {x.shape}")

    B, C, H, W = x.shape
    itemsize = jnp.dtype(x.dtype).itemsize
    n = H * W

    if n % _LANE == 0:
        # Aligned path: flatten spatial dims (free for contiguous NCHW) into
        # lane-dense (rows, 128) planes -> full-width unmasked vector stores.
        rows = n // _LANE
        xr = x.reshape(B, C, rows, _LANE)
        row_tile = _pick_row_tile(rows, _LANE * itemsize, B)
        out = _launch(xr, row_tile).reshape(B, C, H, W)
    else:
        # Unaligned H*W: no pad/slice HBM round-trips. Keep the (B,3,H,W) layout,
        # tile over H with full W as the lane dim; the ragged trailing H tile is
        # masked by Pallas (stores may be lane-masked when W < 128, but that is
        # far cheaper than 3x total HBM traffic from pad + slice).
        h_tile = _pick_row_tile(H, W * itemsize, B)
        out = _launch(x, h_tile)

    if squeeze_batch:
        out = out[0]
    return out


def _rgb_to_yuv_ref(x: jnp.ndarray) -> jnp.ndarray:
    r = x[..., 0:1, :, :].astype(jnp.float32)
    g = x[..., 1:2, :, :].astype(jnp.float32)
    b = x[..., 2:3, :, :].astype(jnp.float32)
    y = 0.299 * r + 0.587 * g + 0.114 * b
    u = -0.147 * r - 0.289 * g + 0.436 * b
    v = 0.615 * r - 0.515 * g - 0.1 * b
    return jnp.concatenate((y, u, v), axis=-3).astype(x.dtype)


if __name__ == "__main__":
    key = jax.random.PRNGKey(0)
    k1, k2, k3, k4 = jax.random.split(key, 4)

    # Small batched image, H*W divisible by 128 (aligned path).
    x = jax.random.uniform(k1, (2, 3, 16, 16), dtype=jnp.float32)  # values in (0, 1)
    out = jax.block_until_ready(rgb_to_yuv(x))
    ref = _rgb_to_yuv_ref(x)
    assert out.shape == ref.shape, (out.shape, ref.shape)
    assert jnp.allclose(out, ref, atol=1e-6, rtol=1e-6), "mismatch vs reference (batched)"

    # Larger aligned image: exercises the multi-step pipelined grid (grid=(1, 8)).
    x_big = jax.random.uniform(k2, (1, 3, 256, 256), dtype=jnp.float32)
    out_big = jax.block_until_ready(rgb_to_yuv(x_big))
    ref_big = _rgb_to_yuv_ref(x_big)
    assert jnp.allclose(out_big, ref_big, atol=1e-6, rtol=1e-6), "mismatch vs reference (big)"

    # Unbatched, odd spatial size -> padless unaligned path + ragged H tile masking.
    x_odd = jax.random.uniform(k3, (3, 17, 19), dtype=jnp.float32)
    out_odd = jax.block_until_ready(rgb_to_yuv(x_odd))
    ref_odd = _rgb_to_yuv_ref(x_odd)
    assert out_odd.shape == ref_odd.shape, (out_odd.shape, ref_odd.shape)
    assert jnp.allclose(out_odd, ref_odd, atol=1e-6, rtol=1e-6), "mismatch vs reference (odd)"

    # bf16 I/O -> byte-budget tile scaling; math still in f32 inside the kernel.
    x_bf = jax.random.uniform(k4, (2, 3, 32, 32), dtype=jnp.float32).astype(jnp.bfloat16)
    out_bf = jax.block_until_ready(rgb_to_yuv(x_bf))
    ref_bf = _rgb_to_yuv_ref(x_bf)
    assert out_bf.shape == ref_bf.shape, (out_bf.shape, ref_bf.shape)
    assert jnp.allclose(out_bf.astype(jnp.float32), ref_bf.astype(jnp.float32),
                        atol=2e-2, rtol=2e-2), "mismatch vs reference (bf16)"

    print("KERNEL_OK")
</pallas_src>

<mosaic_0001>
module attributes {stable_mosaic.version = 11 : i64} {
  func.func @_rgb_to_yuv_kernel(%arg0: i32, %arg1: i32, %arg2: memref<1x3x2x128xf32, #tpu.memory_space<vmem>>, %arg3: memref<1x3x2x128xf32, #tpu.memory_space<vmem>>) attributes {dimension_semantics = [#tpu.dimension_semantics<parallel>, #tpu.dimension_semantics<parallel>], iteration_bounds = array<i64: 2, 1>, scalar_prefetch = 0 : i64, scratch_operands = 0 : i64, tpu.core_type = #tpu.core_type<tc>, window_params = [{transform_indices = @transform_0, window_bounds = array<i64: 1, 3, 2, 128>}, {transform_indices = @transform_1, window_bounds = array<i64: 1, 3, 2, 128>}]} {
    %c0 = arith.constant 0 : index
    %c0_0 = arith.constant 0 : index
    %c0_1 = arith.constant 0 : index
    %c0_2 = arith.constant 0 : index
    %0 = vector.load %arg2[%c0, %c0_0, %c0_1, %c0_2] : memref<1x3x2x128xf32, #tpu.memory_space<vmem>>, vector<1x1x2x128xf32>
    %1 = vector.shape_cast %0 : vector<1x1x2x128xf32> to vector<2x128xf32>
    %c0_3 = arith.constant 0 : index
    %c1 = arith.constant 1 : index
    %c0_4 = arith.constant 0 : index
    %c0_5 = arith.constant 0 : index
    %2 = vector.load %arg2[%c0_3, %c1, %c0_4, %c0_5] : memref<1x3x2x128xf32, #tpu.memory_space<vmem>>, vector<1x1x2x128xf32>
    %3 = vector.shape_cast %2 : vector<1x1x2x128xf32> to vector<2x128xf32>
    %c0_6 = arith.constant 0 : index
    %c2 = arith.constant 2 : index
    %c0_7 = arith.constant 0 : index
    %c0_8 = arith.constant 0 : index
    %4 = vector.load %arg2[%c0_6, %c2, %c0_7, %c0_8] : memref<1x3x2x128xf32, #tpu.memory_space<vmem>>, vector<1x1x2x128xf32>
    %5 = vector.shape_cast %4 : vector<1x1x2x128xf32> to vector<2x128xf32>
    %cst = arith.constant 2.990000e-01 : f32
    %6 = vector.broadcast %cst : f32 to vector<2x128xf32>
    %7 = arith.mulf %6, %1 : vector<2x128xf32>
    %cst_9 = arith.constant 5.870000e-01 : f32
    %8 = vector.broadcast %cst_9 : f32 to vector<2x128xf32>
    %9 = arith.mulf %8, %3 : vector<2x128xf32>
    %10 = arith.addf %7, %9 : vector<2x128xf32>
    %cst_10 = arith.constant 1.140000e-01 : f32
    %11 = vector.broadcast %cst_10 : f32 to vector<2x128xf32>
    %12 = arith.mulf %11, %5 : vector<2x128xf32>
    %13 = arith.addf %10, %12 : vector<2x128xf32>
    %cst_11 = arith.constant -1.470000e-01 : f32
    %14 = vector.broadcast %cst_11 : f32 to vector<2x128xf32>
    %15 = arith.mulf %14, %1 : vector<2x128xf32>
    %cst_12 = arith.constant 2.890000e-01 : f32
    %16 = vector.broadcast %cst_12 : f32 to vector<2x128xf32>
    %17 = arith.mulf %16, %3 : vector<2x128xf32>
    %18 = arith.subf %15, %17 : vector<2x128xf32>
    %cst_13 = arith.constant 4.360000e-01 : f32
    %19 = vector.broadcast %cst_13 : f32 to vector<2x128xf32>
    %20 = arith.mulf %19, %5 : vector<2x128xf32>
    %21 = arith.addf %18, %20 : vector<2x128xf32>
    %cst_14 = arith.constant 6.150000e-01 : f32
    %22 = vector.broadcast %cst_14 : f32 to vector<2x128xf32>
    %23 = arith.mulf %22, %1 : vector<2x128xf32>
    %cst_15 = arith.constant 5.150000e-01 : f32
    %24 = vector.broadcast %cst_15 : f32 to vector<2x128xf32>
    %25 = arith.mulf %24, %3 : vector<2x128xf32>
    %26 = arith.subf %23, %25 : vector<2x128xf32>
    %cst_16 = arith.constant 1.000000e-01 : f32
    %27 = vector.broadcast %cst_16 : f32 to vector<2x128xf32>
    %28 = arith.mulf %27, %5 : vector<2x128xf32>
    %29 = arith.subf %26, %28 : vector<2x128xf32>
    %c0_17 = arith.constant 0 : index
    %c0_18 = arith.constant 0 : index
    %c0_19 = arith.constant 0 : index
    %c0_20 = arith.constant 0 : index
    %30 = vector.load %arg3[%c0_17, %c0_18, %c0_19, %c0_20] : memref<1x3x2x128xf32, #tpu.memory_space<vmem>>, vector<1x1x2x128xf32>
    %31 = vector.shape_cast %30 : vector<1x1x2x128xf32> to vector<2x128xf32>
    %32 = vector.shape_cast %13 : vector<2x128xf32> to vector<1x1x2x128xf32>
    tpu.vector_store %arg3[%c0_17, %c0_18, %c0_19, %c0_20], %32 {strides = array<i32>} : memref<1x3x2x128xf32, #tpu.memory_space<vmem>>, vector<1x1x2x128xf32>,
    %c0_21 = arith.constant 0 : index
    %c1_22 = arith.constant 1 : index
    %c0_23 = arith.constant 0 : index
    %c0_24 = arith.constant 0 : index
    %33 = vector.load %arg3[%c0_21, %c1_22, %c0_23, %c0_24] : memref<1x3x2x128xf32, #tpu.memory_space<vmem>>, vector<1x1x2x128xf32>
    %34 = vector.shape_cast %33 : vector<1x1x2x128xf32> to vector<2x128xf32>
    %35 = vector.shape_cast %21 : vector<2x128xf32> to vector<1x1x2x128xf32>
    tpu.vector_store %arg3[%c0_21, %c1_22, %c0_23, %c0_24], %35 {strides = array<i32>} : memref<1x3x2x128xf32, #tpu.memory_space<vmem>>, vector<1x1x2x128xf32>,
    %c0_25 = arith.constant 0 : index
    %c2_26 = arith.constant 2 : index
    %c0_27 = arith.constant 0 : index
    %c0_28 = arith.constant 0 : index
    %36 = vector.load %arg3[%c0_25, %c2_26, %c0_27, %c0_28] : memref<1x3x2x128xf32, #tpu.memory_space<vmem>>, vector<1x1x2x128xf32>
    %37 = vector.shape_cast %36 : vector<1x1x2x128xf32> to vector<2x128xf32>
    %38 = vector.shape_cast %29 : vector<2x128xf32> to vector<1x1x2x128xf32>
    tpu.vector_store %arg3[%c0_25, %c2_26, %c0_27, %c0_28], %38 {strides = array<i32>} : memref<1x3x2x128xf32, #tpu.memory_space<vmem>>, vector<1x1x2x128xf32>,
    return
  }
  func.func @transform_0(%arg0: i32, %arg1: i32) -> (i32, i32, i32, i32) {
    %c0_i32 = arith.constant 0 : i32
    %c0_i32_0 = arith.constant 0 : i32
    %c0_i32_1 = arith.constant 0 : i32
    return %arg0, %c0_i32, %arg1, %c0_i32_0 : i32, i32, i32, i32
  }
  func.func @transform_1(%arg0: i32, %arg1: i32) -> (i32, i32, i32, i32) {
    %c0_i32 = arith.constant 0 : i32
    %c0_i32_0 = arith.constant 0 : i32
    %c0_i32_1 = arith.constant 0 : i32
    return %arg0, %c0_i32, %arg1, %c0_i32_0 : i32, i32, i32, i32
  }
}

</mosaic_0001>

<bundles_post_ra>
// kernel: tpu_custom_call.1
= control target key start
LH: loop header
LB: loop body
LE: loop exit
PB: predicated region body
PF: predicated region fallthrough
CT: control target
= control target key end

     0   :  { %6 = vsyncpa [#allocation3], 0  ;;  %s632_s0 = inlined_call_operand.hbm [shape: f32[2,3,2,128], index: 0, kind: input, shape index: {}]   ;;  %s633_s1 = inlined_call_operand.hbm [shape: f32[2,3,2,128], index: 1, kind: output, shape index: {}]  }
   0x1   :  { %8 = vsyncpa [#allocation3 + $0x1], 0 }
   0x2   :  { %9 = vsyncpa [#allocation4], 0 }
   0x3   :  { %11 = vsyncpa [#allocation4 + $0x1], 0  ;;  %s486_s6 = smov 0   ;;  %s488_s7 = smov 0  }
   0x4   :  { %s490_s8 = smov 0   ;;  %s492_s9 = smov 0  }
   0x5   :  { %s494_s10 = smov 0   ;;  %s496_s11 = smov 0  }
   0x6 LB: > { %s277_s12 = sadd.s32 4294967295, %s468_s11   ;;  %s278_s13 = sadd.s32 4294967294, %s468_s11   ;;  %s468_s11 = sphi %s496_s11, %s17_s11   ;;  %s464_s10 = sphi %s494_s10, %s644_s10   ;;  %s460_s9 = sphi %s492_s9, %s643_s9   ;;  %s456_s8 = sphi %s490_s8, %s642_s8   ;;  %s452_s7 = sphi %s488_s7, %s641_s7   ;;  %s448_s6 = sphi %s486_s6, %s640_s6  }
   0x7   : > { %s29_s14 = sadd.s32 1, %s464_s10  ;;  %s38_s15 = sadd.s32 1, %s456_s8 }
   0x8   : > { %p31_p0 = scmp.ge.s32.totalorder %s29_s14, 2  ;;  %p45_p1 = scmp.ne.s32.totalorder %s456_s8, %s452_s7 }
   0x9   : > { %p46_p2 = scmp.eq.s32.totalorder %s468_s11, 0  ;;  %p51_p3 = scmp.ne.s32.totalorder %s452_s7, %s448_s6 }
   0xa   : > { %s646_s14 = smov (%p31_p0, %s29_s14), 0  ;;  %p52_p5 = scmp.eq.s32.totalorder %s277_s12, 0 }
   0xb   : > { %p527_p4 = por %p46_p2, %p45_p1  ;;  %s33_s17 = ssub.s32 %s464_s10, %s646_s14 }
   0xc   : > { %p77_p6 = scmp.eq.s32.totalorder %s277_s12, 1  ;;  %p36_p7 = scmp.eq.s32.totalorder %s33_s17, 0 }
   0xd   : > { %p533_p8 = por %p52_p5, %p51_p3  ;;  %p83_p10 = scmp.eq.s32.totalorder %s278_s13, 1 }
   0xe   : > { %p537_p9 = por %p77_p6, %p45_p1  ;;  %p306_p13 = scmp.lt.s32.totalorder %s468_s11, 2 }
   0xf   : > { %s542_s20 = scalar_select %p36_p7, %s456_s8, %s38_s15  }
  0x10   : > { %p544_p11 = por %p83_p10, %p51_p3  ;;  %s103_s22 = sand.u32 1, %s456_s8  }
  0x11   : > { %s290_s23 = smul.u32 6, %s103_s22  ;;  %p554_p0 = pnand %p306_p13, %p527_p4 }
  0x12   : > { %s291_s24 = smul.u32 96, %s464_s10  ;;  %p282_p1 = scmp.ge.s32.totalorder %s468_s11, 1 }
  0x13   : > { %s107_s29 = scalar_lea.vmem [#allocation2], %s290_s23  ;;  %s104_s2 = scalar_lea.sflag [#allocation3], %s103_s22 }
  0x14   : > { %s114_s28 = scalar_lea.hbm %s632_s0, %s291_s24  ;;  %s115_s30 = sshll.u32 %s107_s29, 4  ;;  %s116_s30 = int_to_ptr.vmem [resolvable:$true] %s115_s30 }
  0x15   : > { %p362_p2 = pneg %p554_p0  ;;  %s373_s3 = scalar_lea.vmem %s116_s30, 96 }
  0x16   : > { %p374_p3 = scmp.ne.s32.totalorder %s116_s30, %s373_s3  ;;  %s470_s4 = smov [#allocation2]  }
  0x17   : > { %s378_s5 = sshll.u32 %s470_s4, 4  ;;  %s379_s5 = int_to_ptr.vmem [resolvable:$false] %s378_s5 }
  0x18   : > { %p376_p5 = pnand %p374_p3, %p362_p2  ;;  %s380_s12 = scalar_lea.vmem %s379_s5, 192 }
  0x19   : > { %p381_p4 = scmp.lt.s32.totalorder %s116_s30, %s379_s5  ;;  %p382_p7 = scmp.lt.s32.totalorder %s380_s12, %s373_s3 }
  0x1a   : > { %p377_p6 = pneg %p376_p5 }
  0x1b   : > { %p383_p10 = por %p382_p7, %p381_p4 }
  0x1d   : > { %p384_p13 = pnand %p383_p10, %p377_p6 }
  0x1f   : > { %387 = shalt.err (!%p384_p13)
}
  0x20   : > { %s471_s13 = smov 32   ;;  %s472_s15 = smov 2  }
  0x21   : > { %301 = dma.hbm_to_vmem [thread:$0]  (!%p554_p0), %s114_s28, 96, %s116_s30, %s104_s2, %s471_s13, %s471_s13, %s472_s15  }
  0x22   : > { %p123_p12 = scmp.lt.s32.totalorder %s468_s11, 3 }
  0x24   : > { %p124_p2 = pnand %p282_p1, %p123_p12 }
  0x25   : > { %s570_s16 = sand.u32 (!%p124_p2), 1, %s452_s7  }
  0x26   : > { %127 = sbr.rel (%p124_p2) target bundleno = 71 (0x47), region = 24  ;;  %s130_s22 = scalar_lea.sflag (!%p124_p2), [#allocation3], %s570_s16 }
  0x27   : > { %s292_s17 = smul.u32 (!%p124_p2), 6, %s570_s16 }
  0x29   : > { %s133_s23 = scalar_lea.vmem (!%p124_p2), [#allocation2], %s292_s17 }
  0x2b   : > { %439 = dma.done.wait (%p533_p8), %s130_s22, 96  }
  0x2c   : > { %441 = vsyncadd (%p533_p8), %s130_s22, 4294967200  ;;  %s151_s24 = scalar_lea.vmem [#allocation5], %s292_s17  ;;  %s293_s26 = smul.u32 96, %s460_s9  ;;  %v152_v0 = vld [vmem:[%s133_s23] sm:$0x3] }
  0x2d   : > { %s192_s25 = sshll.u32 %s151_s24, 4  ;;  %v283_v1 = vld [vmem:[%s133_s23 + $0x2] sm:$0x3]  ;;  %v284_v2 = vld [vmem:[%s133_s23 + $0x4] sm:$0x3]  ;;  %s178_s28 = scalar_lea.sflag [#allocation4], %s570_s16  ;;  %s579_s25 = int_to_ptr.vmem [resolvable:$true] %s192_s25 }
  0x2e   : > { %v157_v3 = vmul.f32 0.299, %v152_v0  ;;  %v158_v4 = vmul.f32 0.587, %v283_v1  ;;  %v160_v5 = vmul.f32 0.114, %v284_v2  ;;  %s584_s27 = scalar_lea.hbm %s633_s1, %s293_s26 }
  0x2f   : > { %v162_v6 = vmul.f32 -0.147, %v152_v0  ;;  %v163_v7 = vmul.f32 0.289, %v283_v1  ;;  %v165_v8 = vmul.f32 0.436, %v284_v2 }
  0x30   : > { %v159_v9 = vadd.f32 %v158_v4, %v157_v3  ;;  %v167_v10 = vmul.f32 0.615, %v152_v0  ;;  %v168_v11 = vmul.f32 0.515, %v283_v1  ;;  %v170_v12 = vmul.f32 0.1, %v284_v2 }
  0x31   : > { %v164_v13 = vsub.f32 %v162_v6, %v163_v7  ;;  %s388_s29 = scalar_lea.vmem %s579_s25, 96  ;;  %s473_s30 = smov [#allocation5]  }
  0x32   : > { %v161_v14 = vadd.f32 %v160_v5, %v159_v9  ;;  %v169_v15 = vsub.f32 %v167_v10, %v168_v11  ;;  %p389_p8 = scmp.ne.s32.totalorder %s579_s25, %s388_s29  ;;  %s392_s2 = sshll.u32 %s473_s30, 4  ;;  %s393_s2 = int_to_ptr.vmem [resolvable:$false] %s392_s2 }
  0x33   : > { %v166_v16 = vadd.f32 %v165_v8, %v164_v13  ;;  %s394_s3 = scalar_lea.vmem %s393_s2, 192  ;;  %p395_p1 = scmp.lt.s32.totalorder %s579_s25, %s393_s2 }
  0x34   : > { %172 = vst [vmem:[%s151_s24] sm:$0x3] %v161_v14  ;;  %v171_v17 = vsub.f32 %v169_v15, %v170_v12  ;;  %p390_p12 = pnand %p389_p8, %p537_p9  ;;  %p396_p3 = scmp.lt.s32.totalorder %s394_s3, %s388_s29 }
  0x35   : > { %285 = vst [vmem:[%s151_s24 + $0x2] sm:$0x3] %v166_v16 }
  0x36   : > { %286 = vst [vmem:[%s151_s24 + $0x4] sm:$0x3] %v171_v17  ;;  %p391_p0 = pneg %p390_p12  ;;  %p397_p5 = por %p396_p3, %p395_p1 }
  0x38   : > { %p398_p6 = pnand %p397_p5, %p391_p0 }
  0x3a   : > { %401 = shalt.err (!%p398_p6)
}
  0x3b   : > { %s402_s4 = scalar_lea.hbm %s584_s27, 96  ;;  %s406_s13 = scalar_lea.hbm %s633_s1, 192 }
  0x3c   : > { %p403_p4 = scmp.ne.s32.totalorder %s584_s27, %s402_s4  ;;  %p407_p13 = scmp.lt.s32.totalorder %s584_s27, %s633_s1 }
  0x3d   : > { %p408_p2 = scmp.lt.s32.totalorder %s406_s13, %s402_s4 }
  0x3e   : > { %p404_p7 = pnand %p403_p4, %p537_p9 }
  0x3f   : > { %p409_p8 = por %p408_p2, %p407_p13 }
  0x40   : > { %p405_p10 = pneg %p404_p7 }
  0x42   : > { %p410_p12 = pnand %p409_p8, %p405_p10 }
  0x44   : > { %413 = shalt.err (!%p410_p12)
}
  0x45   : > { %s474_s22 = smov 32   ;;  %s475_s23 = smov 2  }
  0x46   : > { %296 = dma.vmem_to_hbm [thread:$0]  (%p537_p9), %s579_s25, 96, %s584_s27, %s178_s28, %s474_s22, %s474_s22, %s475_s23  }
  0x47 PF: > { %s207_s24 = sand.u32 1, %s448_s6   ;;  %p639_p0 = scmp.ge.s32.totalorder %s468_s11, 2 }
  0x48   : > { %s208_s26 = scalar_lea.sflag [#allocation4], %s207_s24 }
  0x49   : > { %p303_p1 = pnand %p639_p0, %p544_p11 }
  0x4b   : > { %p304_p3 = pneg %p303_p1 }
  0x4d   : > { %443 = dma.done.wait (%p304_p3), %s208_s26, 96  }
  0x4e   : > { %445 = vsyncadd (%p304_p3), %s208_s26, 4294967200  ;;  %s17_s11 = sadd.s32 1, %s468_s11   ;;  %s640_s6 = smov %s452_s7 }
  0x4f   : > { %p14_p5 = scmp.ge.s32.totalorder %s17_s11, 4   ;;  %s641_s7 = smov %s456_s8 }
  0x50   : > { %s642_s8 = smov %s542_s20  ;;  %s643_s9 = smov %s464_s10 }
  0x51   : > { %s644_s10 = smov %s646_s14  ;;  %16 = sbr.rel (!%p14_p5) target bundleno = 6 (0x6), region = 73 }
  0x56   :  { %213 = vsyncpa [#allocation3], 1 }
  0x57   :  { %215 = vsyncpa [#allocation3 + $0x1], 1 }
  0x58   :  { %216 = vsyncpa [#allocation4], 1 }
  0x59   :  { %218 = vsyncpa [#allocation4 + $0x1], 1 }

</bundles_post_ra>
